<compile_context>
chip_gen: v5e
topology: v5e:2x2
jax: 0.10.0
libtpu: 0.0.40
codegen_flags: <defaults>
</compile_context>

<pallas_src>
import numpy as np
import jax
import jax.numpy as jnp
from jax.experimental import pallas as pl
from jax.experimental.pallas import tpu as pltpu

# ---- problem sizes (small, consistent with the module) ----
INPUT_DIM = 64
LATENT_DIM = 32
FILTER_NUM = 4
KERNEL_SIZE = 5
BATCH = 8

CONV_OUT = INPUT_DIM - KERNEL_SIZE + 1                 # 60
POOL_K = FILTER_NUM                                    # MaxPool1d kernel == stride == filter_num
POOL_OUT = (CONV_OUT - POOL_K) // POOL_K + 1           # 15
FEAT = FILTER_NUM * POOL_OUT                           # 60 flattened pooled features
BLK = 128                                              # lane width of one pool-phase block
CONV_COLS = POOL_K * BLK                               # 512 (4 phase blocks of 128 lanes)
OUT_W = 128                                            # lane-dense output slab width
DOT_PREC = jax.lax.Precision.HIGHEST                   # pin exact f32 MXU path


def hcae_kernel(x_ref, wc_ref, w1e_ref, b1_ref, w2c_ref, b2_ref, out_ref):
    x = x_ref[...]                                     # (B, 64) f32, resident in VMEM

    # Conv1d for all filters / positions / pool phases as ONE MXU matmul against the banded
    # matrix wc: acc[:, j*128 + f*POOL_OUT + p] = conv_f(x)[4p + j]   (bias folded out).
    acc = jnp.dot(x, wc_ref[...], preferred_element_type=jnp.float32,
                  precision=DOT_PREC)                  # (B, 512)

    # MaxPool1d(kernel=4, stride=4): max over the 4 phase blocks. Slices sit on 128-lane
    # boundaries -> pure vreg selection on the VPU, no cross-lane relayouts.
    m = jnp.maximum(
        jnp.maximum(acc[:, 0 * BLK:1 * BLK], acc[:, 1 * BLK:2 * BLK]),
        jnp.maximum(acc[:, 2 * BLK:3 * BLK], acc[:, 3 * BLK:4 * BLK]),
    )                                                  # (B, 128); lanes 0..59 are the features

    # Compression Linear + ReLU. Rows 0..59 of w1e are W1.T (flatten order f*POOL_OUT + p),
    # rows 60..127 are zero; conv bias is pre-folded into b1.  K = 128 -> single MXU pass.
    z = jnp.maximum(
        jnp.dot(m, w1e_ref[...], preferred_element_type=jnp.float32,
                precision=DOT_PREC) + b1_ref[...],
        0.0)                                           # (B, 32)

    # TODO(synk): nn.Dropout(0.2) (applied twice in the torch forward) is the eval-mode identity.

    # Decoder Linear + Sigmoid, fused with an identity pass-through of z into one lane-dense
    # (B, 128) result: w2c = [I(32) | W2.T | 0], b2c nonzero only in lanes 32:96.
    y = jnp.dot(z, w2c_ref[...], preferred_element_type=jnp.float32,
                precision=DOT_PREC) + b2_ref[...]      # (B, 128)
    lane = jax.lax.broadcasted_iota(jnp.int32, y.shape, 1)
    sig_lanes = (lane >= LATENT_DIM) & (lane < LATENT_DIM + INPUT_DIM)
    out_ref[...] = jnp.where(sig_lanes, jax.nn.sigmoid(y), y)   # single full-width vst


def prepare_hcae_params(conv_w, conv_b, w1, b1, w2, b2):
    """One-time wrapper-side restructuring of the PyTorch parameters."""
    conv_w = np.asarray(conv_w, np.float32)
    conv_b = np.asarray(conv_b, np.float32)
    w1 = np.asarray(w1, np.float32)
    b1 = np.asarray(b1, np.float32)
    w2 = np.asarray(w2, np.float32)
    b2 = np.asarray(b2, np.float32)

    # Banded conv-as-matmul matrix with the 4 max-pool window phases as four dense 128-lane
    # blocks: column j*128 + f*POOL_OUT + p carries the 5 conv taps of filter f applied at
    # sequence position 4*p + j (rows 4p+j .. 4p+j+4).
    jj, ff, pp, kk = np.meshgrid(np.arange(POOL_K), np.arange(FILTER_NUM),
                                 np.arange(POOL_OUT), np.arange(KERNEL_SIZE), indexing="ij")
    rows = (POOL_K * pp + jj + kk).ravel()
    cols = (jj * BLK + ff * POOL_OUT + pp).ravel()
    wc = np.zeros((INPUT_DIM, CONV_COLS), np.float32)
    wc[rows, cols] = conv_w[ff.ravel(), kk.ravel()]

    # Compression weight, padded to the 128-lane feature block: rows 0..59 = W1.T, rest zero.
    w1e = np.zeros((BLK, LATENT_DIM), np.float32)
    w1e[:FEAT, :] = w1.T

    # Conv bias folded through the max-pool (max(a + b) == max(a) + b for a per-filter constant)
    # into the compression bias: b1' = b1 + W1 @ repeat(conv_b, POOL_OUT).
    b1_eff = b1 + w1 @ np.repeat(conv_b, POOL_OUT)

    # Decoder weight with an identity pass-through block so the kernel emits one lane-dense
    # (B, 128) output: lanes 0:32 = z (compressed), lanes 32:96 = decoder pre-activation.
    w2c = np.zeros((LATENT_DIM, OUT_W), np.float32)
    w2c[:, :LATENT_DIM] = np.eye(LATENT_DIM, dtype=np.float32)
    w2c[:, LATENT_DIM:LATENT_DIM + INPUT_DIM] = w2.T
    b2c = np.zeros((1, OUT_W), np.float32)
    b2c[0, LATENT_DIM:LATENT_DIM + INPUT_DIM] = b2

    return (jnp.asarray(wc), jnp.asarray(w1e),
            jnp.asarray(b1_eff.reshape(1, LATENT_DIM)),
            jnp.asarray(w2c), jnp.asarray(b2c))


@jax.jit
def hcae_forward(x, wc, w1e, b1e, w2c, b2c):
    vmem = pl.BlockSpec(memory_space=pltpu.MemorySpace.VMEM)
    out = pl.pallas_call(
        hcae_kernel,
        out_shape=jax.ShapeDtypeStruct((x.shape[0], OUT_W), jnp.float32),
        in_specs=[vmem, vmem, vmem, vmem, vmem, vmem],
        out_specs=vmem,
    )(x, wc, w1e, b1e, w2c, b2c)
    compressed = out[:, :LATENT_DIM]
    reconstructed = out[:, LATENT_DIM:LATENT_DIM + INPUT_DIM]
    return compressed, reconstructed


def hcae_reference(x, conv_w, conv_b, w1, b1, w2, b2):
    """Pure-JAX reference mirroring the PyTorch forward (eval mode)."""
    B = x.shape[0]
    cols = jnp.stack([x[:, k:k + CONV_OUT] for k in range(KERNEL_SIZE)], axis=-1)   # (B, T, K)
    conv = jnp.einsum('btk,fk->bft', cols, conv_w,
                      precision=DOT_PREC) + conv_b[None, :, None]                   # (B, F, T)
    pooled = conv[:, :, :POOL_OUT * POOL_K].reshape(
        B, FILTER_NUM, POOL_OUT, POOL_K).max(axis=-1)                               # (B, F, P)
    feat = pooled.reshape(B, FILTER_NUM * POOL_OUT)
    z = jnp.maximum(jnp.dot(feat, w1.T, precision=DOT_PREC) + b1, 0.0)
    rec = jax.nn.sigmoid(jnp.dot(z, w2.T, precision=DOT_PREC) + b2)
    return z, rec


if __name__ == "__main__":
    key = jax.random.PRNGKey(0)
    ks = jax.random.split(key, 7)

    def unif(k, shape, fan_in):
        bound = 1.0 / float(fan_in) ** 0.5
        return jax.random.uniform(k, shape, jnp.float32, -bound, bound)

    x = jax.random.normal(ks[0], (BATCH, INPUT_DIM), jnp.float32)
    conv_w = unif(ks[1], (FILTER_NUM, KERNEL_SIZE), KERNEL_SIZE)                    # Conv1d weight (F,1,K) squeezed
    conv_b = unif(ks[2], (FILTER_NUM,), KERNEL_SIZE)                                # Conv1d bias
    w1 = unif(ks[3], (LATENT_DIM, FILTER_NUM * POOL_OUT), FILTER_NUM * POOL_OUT)    # compression Linear
    b1 = unif(ks[4], (LATENT_DIM,), FILTER_NUM * POOL_OUT)
    w2 = unif(ks[5], (INPUT_DIM, LATENT_DIM), LATENT_DIM)                           # decoder Linear
    b2 = unif(ks[6], (INPUT_DIM,), LATENT_DIM)

    # One-time parameter restructuring (weights are constants in deployment).
    wc, w1e, b1e, w2c, b2c = prepare_hcae_params(conv_w, conv_b, w1, b1, w2, b2)

    compressed, reconstructed = hcae_forward(x, wc, w1e, b1e, w2c, b2c)
    jax.block_until_ready((compressed, reconstructed))

    comp_ref, rec_ref = hcae_reference(x, conv_w, conv_b, w1, b1, w2, b2)
    assert compressed.shape == (BATCH, LATENT_DIM)
    assert reconstructed.shape == (BATCH, INPUT_DIM)
    assert jnp.allclose(compressed, comp_ref, atol=1e-5, rtol=1e-5)
    assert jnp.allclose(reconstructed, rec_ref, atol=1e-5, rtol=1e-5)
    print("KERNEL_OK")
</pallas_src>

<mosaic_0001>
module attributes {stable_mosaic.version = 11 : i64} {
  func.func @hcae_kernel(%arg0: memref<8x64xf32, #tpu.memory_space<vmem>>, %arg1: memref<64x512xf32, #tpu.memory_space<vmem>>, %arg2: memref<128x32xf32, #tpu.memory_space<vmem>>, %arg3: memref<1x32xf32, #tpu.memory_space<vmem>>, %arg4: memref<32x128xf32, #tpu.memory_space<vmem>>, %arg5: memref<1x128xf32, #tpu.memory_space<vmem>>, %arg6: memref<8x128xf32, #tpu.memory_space<vmem>>) attributes {dimension_semantics = [], scalar_prefetch = 0 : i64, scratch_operands = 0 : i64, tpu.core_type = #tpu.core_type<tc>} {
    %c0 = arith.constant 0 : index
    %c0_0 = arith.constant 0 : index
    %0 = vector.load %arg0[%c0, %c0_0] : memref<8x64xf32, #tpu.memory_space<vmem>>, vector<8x64xf32>
    %c0_1 = arith.constant 0 : index
    %c0_2 = arith.constant 0 : index
    %1 = vector.load %arg1[%c0_1, %c0_2] : memref<64x512xf32, #tpu.memory_space<vmem>>, vector<64x512xf32>
    %cst = arith.constant dense<0.000000e+00> : vector<8x512xf32>
    %2 = tpu.matmul %0, %1, %cst {dimension_numbers = #tpu.dot_dimension_numbers<[1], [0], [0], [1], [0, 0, 1, 1], [], []>, precision = #tpu.contract_precision<fp32>} : vector<8x64xf32>, vector<64x512xf32>, vector<8x512xf32> -> vector<8x512xf32>
    %3 = vector.extract_strided_slice %2 {offsets = [0, 0], sizes = [8, 128], strides = [1, 1]} : vector<8x512xf32> to vector<8x128xf32>
    %4 = vector.extract_strided_slice %2 {offsets = [0, 128], sizes = [8, 128], strides = [1, 1]} : vector<8x512xf32> to vector<8x128xf32>
    %5 = arith.maximumf %3, %4 : vector<8x128xf32>
    %6 = vector.extract_strided_slice %2 {offsets = [0, 256], sizes = [8, 128], strides = [1, 1]} : vector<8x512xf32> to vector<8x128xf32>
    %7 = vector.extract_strided_slice %2 {offsets = [0, 384], sizes = [8, 128], strides = [1, 1]} : vector<8x512xf32> to vector<8x128xf32>
    %8 = arith.maximumf %6, %7 : vector<8x128xf32>
    %9 = arith.maximumf %5, %8 : vector<8x128xf32>
    %c0_3 = arith.constant 0 : index
    %c0_4 = arith.constant 0 : index
    %10 = vector.load %arg2[%c0_3, %c0_4] : memref<128x32xf32, #tpu.memory_space<vmem>>, vector<128x32xf32>
    %cst_5 = arith.constant dense<0.000000e+00> : vector<8x32xf32>
    %11 = tpu.matmul %9, %10, %cst_5 {dimension_numbers = #tpu.dot_dimension_numbers<[1], [0], [0], [1], [0, 0, 1, 1], [], []>, precision = #tpu.contract_precision<fp32>} : vector<8x128xf32>, vector<128x32xf32>, vector<8x32xf32> -> vector<8x32xf32>
    %c0_6 = arith.constant 0 : index
    %c0_7 = arith.constant 0 : index
    %12 = vector.load %arg3[%c0_6, %c0_7] : memref<1x32xf32, #tpu.memory_space<vmem>>, vector<1x32xf32>
    %13 = vector.broadcast %12 : vector<1x32xf32> to vector<8x32xf32>
    %14 = arith.addf %11, %13 : vector<8x32xf32>
    %cst_8 = arith.constant 0.000000e+00 : f32
    %15 = vector.broadcast %cst_8 : f32 to vector<8x32xf32>
    %16 = arith.maximumf %14, %15 : vector<8x32xf32>
    %c0_9 = arith.constant 0 : index
    %c0_10 = arith.constant 0 : index
    %17 = vector.load %arg4[%c0_9, %c0_10] : memref<32x128xf32, #tpu.memory_space<vmem>>, vector<32x128xf32>
    %cst_11 = arith.constant dense<0.000000e+00> : vector<8x128xf32>
    %18 = tpu.matmul %16, %17, %cst_11 {dimension_numbers = #tpu.dot_dimension_numbers<[1], [0], [0], [1], [0, 0, 1, 1], [], []>, precision = #tpu.contract_precision<fp32>} : vector<8x32xf32>, vector<32x128xf32>, vector<8x128xf32> -> vector<8x128xf32>
    %c0_12 = arith.constant 0 : index
    %c0_13 = arith.constant 0 : index
    %19 = vector.load %arg5[%c0_12, %c0_13] : memref<1x128xf32, #tpu.memory_space<vmem>>, vector<1x128xf32>
    %20 = vector.broadcast %19 : vector<1x128xf32> to vector<8x128xf32>
    %21 = arith.addf %18, %20 : vector<8x128xf32>
    %22 = tpu.iota {dimensions = array<i32: 1>} : vector<8x128xi32>
    %c32_i32 = arith.constant 32 : i32
    %23 = vector.broadcast %c32_i32 : i32 to vector<8x128xi32>
    %24 = arith.cmpi sge, %22, %23 : vector<8x128xi32>
    %c96_i32 = arith.constant 96 : i32
    %25 = vector.broadcast %c96_i32 : i32 to vector<8x128xi32>
    %26 = arith.cmpi slt, %22, %25 : vector<8x128xi32>
    %27 = arith.andi %24, %26 : vector<8x128xi1>
    %28 = arith.negf %21 : vector<8x128xf32>
    %29 = math.exp %28 : vector<8x128xf32>
    %cst_14 = arith.constant 1.000000e+00 : f32
    %30 = vector.broadcast %cst_14 : f32 to vector<8x128xf32>
    %31 = arith.addf %30, %29 : vector<8x128xf32>
    %32 = arith.divf %30, %31 : vector<8x128xf32>
    %33 = arith.select %27, %32, %21 : vector<8x128xi1>, vector<8x128xf32>
    %c0_15 = arith.constant 0 : index
    %c0_16 = arith.constant 0 : index
    %34 = vector.load %arg6[%c0_15, %c0_16] : memref<8x128xf32, #tpu.memory_space<vmem>>, vector<8x128xf32>
    tpu.vector_store %arg6[%c0_15, %c0_16], %33 {strides = array<i32>} : memref<8x128xf32, #tpu.memory_space<vmem>>, vector<8x128xf32>,
    return
  }
}

</mosaic_0001>

<bundles_post_ra>
// kernel: hcae_forward.1
= control target key start
LH: loop header
LB: loop body
LE: loop exit
PB: predicated region body
PF: predicated region fallthrough
CT: control target
= control target key end

     0   :  { %11 = vsyncpa [#allocation3], 0  ;;  %s1653_s24 = smov [#allocation2]   ;;  %s1654_s26 = smov 512   ;;  %s2501_s0 = inlined_call_operand.vmem [shape: f32[8,64], index: 0, kind: input, shape index: {}]   ;;  %s2502_s1 = inlined_call_operand.hbm [shape: f32[64,512], index: 1, kind: input, shape index: {}]   ;;  %s2503_s2 = inlined_call_operand.vmem [shape: f32[128,32], index: 2, kind: input, shape index: {}]   ;;  %s2504_s3 = inlined_call_operand.vmem [shape: f32[1,32], index: 3, kind: input, shape index: {}]   ;;  %s2505_s4 = inlined_call_operand.vmem [shape: f32[32,128], index: 4, kind: input, shape index: {}]   ;;  %s2506_s5 = inlined_call_operand.vmem [shape: f32[1,128], index: 5, kind: input, shape index: {}]   ;;  %s2507_s6 = inlined_call_operand.vmem [shape: f32[8,128], index: 6, kind: output, shape index: {}]  }
   0x1   :  { %s18_s23 = sshll.u32 %s2502_s1, 4  ;;  %s20_s25 = sshll.u32 %s1653_s24, 4  ;;  %s19_s23 = int_to_ptr.hbm [resolvable:$true] %s18_s23  ;;  %s21_s25 = int_to_ptr.vmem [resolvable:$true] %s20_s25 }
   0x2   :  { %s1655_s27 = smov 32  }
   0x3   :  { %26 = dma.hbm_to_vmem [thread:$0]  %s19_s23, 4096, %s21_s25, [#allocation3], %s1654_s26, %s1654_s26, %s1655_s27  }
   0x4   :  { %1651 = dma.done.wait [#allocation3], 4096  }
   0x5   :  { %1652 = vsyncadd [#allocation3], 4294963200  ;;  %v68_v0 = vld [vmem:[#allocation2 + $0xe0] sm:$0xff]  ;;  %v69_v22 = vld [vmem:[#allocation2 + $0xe8] sm:$0xff]  ;;  %vm72_vm0 = vcmask 523264   ;;  %vm1397_vm1 = vcmask 261120  }
   0x6   :  { %v64_v1 = vld [vmem:[#allocation2 + $0xc0] sm:$0xff]  ;;  %v1694_v3 = vand.u32 4294901760, %v68_v0  ;;  %v65_v30 = vld [vmem:[#allocation2 + $0xc8] sm:$0xff]  ;;  %v1753_v34 = vand.u32 4294901760, %v69_v22 }
   0x7   :  { %v60_v2 = vld [vmem:[#allocation2 + $0xa0] sm:$0xff]  ;;  %v1696_v4 = vand.u32 4294901760, %v64_v1  ;;  %v61_v37 = vld [vmem:[#allocation2 + $0xa8] sm:$0xff]  ;;  %v1765_v42 = vand.u32 4294901760, %v65_v30 }
   0x8   :  { %v1698_v5 = vand.u32 4294901760, %v60_v2  ;;  %v56_v6 = vld [vmem:[#allocation2 + $0x80] sm:$0xff]  ;;  %85 = vmatpush.msra.mxu0 %v1694_v3  ;;  %v1708_v14 = vsub.f32 %v68_v0, %v1694_v3  ;;  %217 = vmatpush.msra.mxu3 %v1694_v3  ;;  %v57_v38 = vld [vmem:[#allocation2 + $0x88] sm:$0xff]  ;;  %v1776_v49 = vsub.f32 %v69_v22, %v1753_v34  ;;  %v1778_v50 = vand.u32 4294901760, %v61_v37 }
   0x9   :  { %v52_v7 = vld [vmem:[#allocation2 + $0x60] sm:$0xff]  ;;  %v1700_v9 = vand.u32 4294901760, %v56_v6  ;;  %v1711_v15 = vsub.f32 %v64_v1, %v1696_v4  ;;  %v53_v43 = vld [vmem:[#allocation2 + $0x68] sm:$0xff]  ;;  %v1781_v51 = vsub.f32 %v65_v30, %v1765_v42  ;;  %v1786_v53 = vand.u32 4294901760, %v57_v38 }
   0xa   :  { %v48_v8 = vld [vmem:[#allocation2 + $0x40] sm:$0xff]  ;;  %v1702_v10 = vand.u32 4294901760, %v52_v7  ;;  %v1715_v16 = vsub.f32 %v60_v2, %v1698_v5  ;;  %180 = vmatpush.msra.mxu2 %v1708_v14  ;;  %87 = vmatpush.msra.mxu0 %v1696_v4  ;;  %v119_v23 = vand.u32 4294901760, %v1708_v14  ;;  %v49_v44 = vld [vmem:[#allocation2 + $0x48] sm:$0xff]  ;;  %v1788_v54 = vand.u32 4294901760, %v53_v43 }
   0xb   :  { %v1704_v11 = vand.u32 4294901760, %v48_v8  ;;  %v44_v12 = vld [vmem:[#allocation2 + $0x20] sm:$0xff]  ;;  %v1720_v18 = vsub.f32 %v56_v6, %v1700_v9  ;;  %v125_v24 = vand.u32 4294901760, %v1711_v15  ;;  %219 = vmatpush.msra.mxu3 %v1696_v4  ;;  %v1790_v55 = vand.u32 4294901760, %v49_v44  ;;  %v45_v56 = vld [vmem:[#allocation2 + $0x28] sm:$0xff] }
   0xc   :  { %v40_v13 = vld [vmem:[#allocation2] sm:$0xff]  ;;  %v1717_v17 = vand.u32 4294901760, %v44_v12  ;;  %v1723_v19 = vsub.f32 %v52_v7, %v1702_v10  ;;  %v131_v25 = vand.u32 4294901760, %v1715_v16  ;;  %183 = vmatpush.msra.mxu2 %v1711_v15  ;;  %89 = vmatpush.msra.mxu0 %v1698_v5  ;;  %v120_v31 = vsub.f32 %v1708_v14, %v119_v23 }
   0xd   :  { %v1726_v20 = vsub.f32 %v48_v8, %v1704_v11  ;;  %v1728_v21 = vand.u32 4294901760, %v40_v13  ;;  %v137_v27 = vand.u32 4294901760, %v1720_v18  ;;  %v126_v32 = vsub.f32 %v1711_v15, %v125_v24  ;;  %221 = vmatpush.msra.mxu3 %v1698_v5  ;;  %v39_v61 = vld [vmem:[%s2501_s0] sm:$0xff] }
   0xe   :  { %v1736_v26 = vsub.f32 %v44_v12, %v1717_v17  ;;  %v143_v28 = vand.u32 4294901760, %v1723_v19  ;;  %v132_v33 = vsub.f32 %v1715_v16, %v131_v25  ;;  %v121_v39 = vand.u32 4294901760, %v120_v31  ;;  %186 = vmatpush.msra.mxu2 %v1715_v16  ;;  %91 = vmatpush.msra.mxu0 %v1700_v9  ;;  %v41_v31 = vld [vmem:[#allocation2 + $0x8] sm:$0xff] }
   0xf   :  { %v149_v29 = vand.u32 4294901760, %v1726_v20  ;;  %v138_v35 = vsub.f32 %v1720_v18, %v137_v27  ;;  %v1760_v36 = vsub.f32 %v40_v13, %v1728_v21  ;;  %v127_v40 = vand.u32 4294901760, %v126_v32  ;;  %223 = vmatpush.msra.mxu3 %v1700_v9 }
  0x10   :  { %v155_v41 = vand.u32 4294901760, %v1736_v26  ;;  %v133_v45 = vand.u32 4294901760, %v132_v33  ;;  %v144_v46 = vsub.f32 %v1723_v19, %v143_v28  ;;  %122 = vmatpush.msra.mxu1 %v121_v39  ;;  %189 = vmatpush.msra.mxu2 %v1720_v18  ;;  %v356_v58 = vand.u32 4294901760, %v1776_v49 }
  0x11   :  { %v150_v47 = vsub.f32 %v1726_v20, %v149_v29  ;;  %v139_v48 = vand.u32 4294901760, %v138_v35  ;;  %93 = vmatpush.msra.mxu0 %v1702_v10  ;;  %225 = vmatpush.msra.mxu3 %v1702_v10  ;;  %v161_v52 = vand.u32 4294901760, %v1760_v36  ;;  %v362_v59 = vand.u32 4294901760, %v1781_v51 }
  0x12   :  { %128 = vmatpush.msra.mxu1 %v127_v40  ;;  %192 = vmatpush.msra.mxu2 %v1723_v19  ;;  %v156_v57 = vsub.f32 %v1736_v26, %v155_v41  ;;  %v1799_v60 = vsub.f32 %v61_v37, %v1778_v50  ;;  %v145_v62 = vand.u32 4294901760, %v144_v46  ;;  %v1807_v63 = vsub.f32 %v57_v38, %v1786_v53 }
  0x13   :  { %95 = vmatpush.msra.mxu0 %v1704_v11  ;;  %227 = vmatpush.msra.mxu3 %v1704_v11  ;;  %v1810_v0 = vsub.f32 %v53_v43, %v1788_v54  ;;  %v1813_v1 = vsub.f32 %v49_v44, %v1790_v55  ;;  %v357_v2 = vsub.f32 %v1776_v49, %v356_v58  ;;  %v1823_v8 = vand.u32 4294901760, %v45_v56 }
  0x14   :  { %134 = vmatpush.msra.mxu1 %v133_v45  ;;  %195 = vmatpush.msra.mxu2 %v1726_v20  ;;  %v363_v6 = vsub.f32 %v1781_v51, %v362_v59  ;;  %v368_v7 = vand.u32 4294901760, %v1799_v60  ;;  %v151_v12 = vand.u32 4294901760, %v150_v47  ;;  %v162_v13 = vsub.f32 %v1760_v36, %v161_v52  ;;  %v58_v20 = vld [vmem:[#allocation2 + $0x90] sm:$0xff] }
  0x15   :  { %97 = vmatpush.msra.mxu0 %v1717_v17  ;;  %229 = vmatpush.msra.mxu3 %v1717_v17  ;;  %v374_v22 = vand.u32 4294901760, %v1807_v63  ;;  %v74_v30 = vsel %vm72_vm0, %v39_v61, 0  ;;  %v358_v32 = vand.u32 4294901760, %v357_v2  ;;  %v380_v35 = vand.u32 4294901760, %v1810_v0 }
  0x16   :  { %140 = vmatpush.msra.mxu1 %v139_v48  ;;  %198 = vmatpush.msra.mxu2 %v1736_v26  ;;  %v369_v33 = vsub.f32 %v1799_v60, %v368_v7  ;;  %v1837_v37 = vand.u32 4294901760, %v74_v30  ;;  %v157_v38 = vand.u32 4294901760, %v156_v57  ;;  %v386_v39 = vand.u32 4294901760, %v1813_v1 }
  0x17   :  { %99 = vmatpush.msra.mxu0 %v1728_v21  ;;  %231 = vmatpush.msra.mxu3 %v1728_v21  ;;  %v364_v40 = vand.u32 4294901760, %v363_v6  ;;  %v375_v43 = vsub.f32 %v1807_v63, %v374_v22  ;;  %v1846_v44 = vand.u32 4294901760, %v41_v31  ;;  %v1849_v45 = vsub.f32 %v45_v56, %v1823_v8 }
  0x18   :  { %146 = vmatpush.msra.mxu1 %v145_v62  ;;  %201 = vmatpush.msra.mxu2 %v1760_v36  ;;  %v1855_v46 = vsub.f32 %v74_v30, %v1837_v37  ;;  %v163_v47 = vand.u32 4294901760, %v162_v13  ;;  %v370_v48 = vand.u32 4294901760, %v369_v33  ;;  %v381_v57 = vsub.f32 %v1810_v0, %v380_v35  ;;  %v50_v36 = vld [vmem:[#allocation2 + $0x50] sm:$0xff] }
  0x19   :  { %250 = vmatpush.msrb.mxu0 %v119_v23  ;;  %359 = vmatpush.msrb.mxu3 %v358_v32  ;;  %v392_v61 = vand.u32 4294901760, %v1849_v45  ;;  %v376_v14 = vand.u32 4294901760, %v375_v43  ;;  %v387_v23 = vsub.f32 %v1813_v1, %v386_v39  ;;  %v1868_v56 = vsub.f32 %v41_v31, %v1846_v44 }
  0x1a   :  { %322 = vmatpush.msrb.mxu2 %v1753_v34  ;;  %152 = vmatpush.msra.mxu1 %v151_v12  ;;  %v1874_v15 = vand.u32 4294901760, %v1855_v46 }
  0x1b   :  { %254 = vmatpush.msrb.mxu0 %v125_v24  ;;  %365 = vmatpush.msrb.mxu3 %v364_v40  ;;  %v382_v24 = vand.u32 4294901760, %v381_v57  ;;  %v393_v62 = vsub.f32 %v1849_v45, %v392_v61  ;;  %v388_v16 = vand.u32 4294901760, %v387_v23 }
  0x1c   :  { %324 = vmatpush.msrb.mxu2 %v1765_v42  ;;  %158 = vmatpush.msra.mxu1 %v157_v38  ;;  %v103_v2 = vsub.f32 %v1855_v46, %v1874_v15  ;;  %v59_v38 = vld [vmem:[#allocation2 + $0x98] sm:$0xff] }
  0x1d   :  { %258 = vmatpush.msrb.mxu0 %v131_v25  ;;  %371 = vmatpush.msrb.mxu3 %v370_v48  ;;  %v398_v25 = vand.u32 4294901760, %v1868_v56  ;;  %v55_v48 = vld [vmem:[#allocation2 + $0x78] sm:$0xff] }
  0x1e   :  { %326 = vmatpush.msrb.mxu2 %v1778_v50  ;;  %164 = vmatpush.msra.mxu1 %v163_v47  ;;  %v1900_v18 = vand.u32 4294901760, %v103_v2  ;;  %v51_v2 = vld [vmem:[#allocation2 + $0x58] sm:$0xff] }
  0x1f   :  { %262 = vmatpush.msrb.mxu0 %v137_v27  ;;  %377 = vmatpush.msrb.mxu3 %v376_v14  ;;  %v1947_v27 = vand.u32 4294901760, %v58_v20  ;;  %v2044_v14 = vand.u32 4294901760, %v59_v38 }
  0x20   :  { %293 = vmatpush.msrb.mxu1 %v1694_v3  ;;  %328 = vmatpush.msrb.mxu2 %v1786_v53  ;;  %v394_v3 = vand.u32 4294901760, %v393_v62 }
  0x21   :  { %266 = vmatpush.msrb.mxu0 %v143_v28  ;;  %383 = vmatpush.msrb.mxu3 %v382_v24  ;;  %v54_v28 = vld [vmem:[#allocation2 + $0x70] sm:$0xff] }
  0x22   :  { %295 = vmatpush.msrb.mxu1 %v1696_v4  ;;  %330 = vmatpush.msrb.mxu2 %v1788_v54  ;;  %v399_v4 = vsub.f32 %v1868_v56, %v398_v25 }
  0x23   :  { %270 = vmatpush.msrb.mxu0 %v149_v29  ;;  %389 = vmatpush.msrb.mxu3 %v388_v16 }
  0x24   :  { %297 = vmatpush.msrb.mxu1 %v1698_v5  ;;  %332 = vmatpush.msrb.mxu2 %v1790_v55  ;;  %v400_v5 = vand.u32 4294901760, %v399_v4 }
  0x25   :  { %274 = vmatpush.msrb.mxu0 %v155_v41  ;;  %395 = vmatpush.msrb.mxu3 %v394_v3 }
  0x26   :  { %299 = vmatpush.msrb.mxu1 %v1700_v9  ;;  %334 = vmatpush.msrb.mxu2 %v1823_v8  ;;  %v70_v9 = vld [vmem:[#allocation2 + $0xf0] sm:$0xff] }
  0x27   :  { %204 = vmatmul.f32.vlgmr.msra.gmra.mxu2 %v1855_v46  ;;  %278 = vmatpush.msrb.mxu0 %v161_v52  ;;  %v1974_v52 = vand.u32 4294901760, %v50_v36 }
  0x28   :  { %301 = vmatpush.msrb.mxu1 %v1702_v10  ;;  %336 = vmatpush.msrb.mxu2 %v1846_v44  ;;  %v66_v10 = vld [vmem:[#allocation2 + $0xd0] sm:$0xff] }
  0x29   :  { %105 = vmatmul.f32.vlgmr.msra.gmra.mxu0 %v1900_v18  ;;  %235 = vmatmul.f32.vlgmr.msra.gmra.mxu3 %v1874_v15  ;;  %v1933_v19 = vand.u32 4294901760, %v66_v10 }
  0x2a   :  { %303 = vmatpush.msrb.mxu1 %v1704_v11  ;;  %417 = vmatpush.msra.mxu0 %v1776_v49  ;;  %v1926_v11 = vand.u32 4294901760, %v70_v9  ;;  %v1968_v49 = vsub.f32 %v58_v20, %v1947_v27  ;;  %v47_v20 = vld [vmem:[#allocation2 + $0x38] sm:$0xff] }
  0x2b   :  { %487 = vmatpush.msra.mxu2 %v356_v58  ;;  %401 = vmatpush.msrb.mxu3 %v400_v5  ;;  %v1952_v29 = vsub.f32 %v66_v10, %v1933_v19  ;;  %v42_v58 = vld [vmem:[#allocation2 + $0x10] sm:$0xff] }
  0x2c   :  { %305 = vmatpush.msrb.mxu1 %v1717_v17  ;;  %420 = vmatpush.msra.mxu0 %v1781_v51  ;;  %v62_v17 = vld [vmem:[#allocation2 + $0xb0] sm:$0xff]  ;;  %v1942_v26 = vsub.f32 %v70_v9, %v1926_v11  ;;  %v2003_v12 = vand.u32 4294901760, %v42_v58  ;;  %v2067_v9 = vsub.f32 %v59_v38, %v2044_v14 }
  0x2d   :  { %166 = vmatmul.f32.vlgmr.msra.gmra.mxu1 %v1837_v37  ;;  %491 = vmatpush.msra.mxu2 %v362_v59  ;;  %v599_v51 = vand.u32 4294901760, %v1952_v29 }
  0x2e   :  { %530 = vmatpush.msra.mxu3 %v1753_v34  ;;  %307 = vmatpush.msrb.mxu1 %v1728_v21  ;;  %v1937_v21 = vand.u32 4294901760, %v62_v17  ;;  %v593_v41 = vand.u32 4294901760, %v1942_v26  ;;  %v2030_v43 = vsub.f32 %v42_v58, %v2003_v12  ;;  %v43_v58 = vld [vmem:[#allocation2 + $0x18] sm:$0xff] }
  0x2f   :  { %423 = vmatpush.msra.mxu0 %v1799_v60  ;;  %495 = vmatpush.msra.mxu2 %v368_v7  ;;  %v600_v6 = vsub.f32 %v1952_v29, %v599_v51  ;;  %v2001_v7 = vsub.f32 %v50_v36, %v1974_v52 }
  0x30   :  { %454 = vmatpush.msra.mxu1 %v1753_v34  ;;  %532 = vmatpush.msra.mxu3 %v1765_v42  ;;  %v1957_v34 = vsub.f32 %v62_v17, %v1937_v21  ;;  %v594_v59 = vsub.f32 %v1942_v26, %v593_v41  ;;  %v635_v62 = vand.u32 4294901760, %v2030_v43  ;;  %v2074_v17 = vand.u32 4294901760, %v51_v2 }
  0x31   :  { %426 = vmatpush.msra.mxu0 %v1807_v63  ;;  %499 = vmatpush.msra.mxu2 %v374_v22  ;;  %v63_v22 = vld [vmem:[#allocation2 + $0xb8] sm:$0xff]  ;;  %v623_v40 = vand.u32 4294901760, %v2001_v7 }
  0x32   :  { %456 = vmatpush.msra.mxu1 %v1765_v42  ;;  %534 = vmatpush.msra.mxu3 %v1778_v50  ;;  %v1963_v42 = vand.u32 4294901760, %v54_v28  ;;  %v636_v36 = vsub.f32 %v2030_v43, %v635_v62 }
  0x33   :  { %342 = vmatmul.f32.vlgmr.msrb.gmra.mxu2 %v1900_v18  ;;  %280 = vmatmul.f32.vlgmr.msrb.gmra.mxu0 %v1837_v37  ;;  %v624_v24 = vsub.f32 %v2001_v7, %v623_v40 }
  0x34   :  { %429 = vmatpush.msra.mxu0 %v1810_v0  ;;  %458 = vmatpush.msra.mxu1 %v1778_v50  ;;  %v46_v50 = vld [vmem:[#allocation2 + $0x30] sm:$0xff]  ;;  %v1986_v60 = vsub.f32 %v54_v28, %v1963_v42 }
  0x35   :  { %503 = vmatpush.msra.mxu2 %v380_v35  ;;  %536 = vmatpush.msra.mxu3 %v1786_v53  ;;  %v1988_v63 = vand.u32 4294901760, %v46_v50  ;;  %v625_v28 = vand.u32 4294901760, %v624_v24 }
  0x36   :  { %403 = vmatmul.f32.vlgmr.msrb.gmra.mxu3 %v1837_v37  ;;  %309 = vmatmul.f32.vlgmr.msrb.gmra.mxu1 %v1837_v37  ;;  %v617_v30 = vand.u32 4294901760, %v1986_v60 }
  0x37   :  { %432 = vmatpush.msra.mxu0 %v1813_v1  ;;  %460 = vmatpush.msra.mxu1 %v1786_v53  ;;  %v71_v53 = vld [vmem:[#allocation2 + $0xf8] sm:$0xff]  ;;  %v2014_v31 = vsub.f32 %v46_v50, %v1988_v63 }
  0x38   :  { %507 = vmatpush.msra.mxu2 %v386_v39  ;;  %538 = vmatpush.msra.mxu3 %v1788_v54  ;;  %v1993_v0 = vand.u32 4294901760, %v71_v53  ;;  %v67_v1 = vld [vmem:[#allocation2 + $0xd8] sm:$0xff]  ;;  %v601_v39 = vand.u32 4294901760, %v600_v6  ;;  %v848_v6 = vand.u32 4294901760, %v2067_v9 }
  0x39   :  { %435 = vmatpush.msra.mxu0 %v1849_v45  ;;  %462 = vmatpush.msra.mxu1 %v1788_v54  ;;  %v605_v54 = vand.u32 4294901760, %v1957_v34  ;;  %v2016_v32 = vand.u32 4294901760, %v67_v1  ;;  %v2032_v45 = vand.u32 4294901760, %v63_v22  ;;  %v629_v57 = vand.u32 4294901760, %v2014_v31 }
  0x3a   :  { %511 = vmatpush.msra.mxu2 %v392_v61  ;;  %540 = vmatpush.msra.mxu3 %v1790_v55  ;;  %v2024_v35 = vsub.f32 %v71_v53, %v1993_v0 }
  0x3b   :  { %438 = vmatpush.msra.mxu0 %v1868_v56  ;;  %464 = vmatpush.msra.mxu1 %v1790_v55  ;;  %v611_v55 = vand.u32 4294901760, %v1968_v49  ;;  %v606_v13 = vsub.f32 %v1957_v34, %v605_v54  ;;  %v2042_v61 = vsub.f32 %v67_v1, %v2016_v32  ;;  %v2055_v16 = vsub.f32 %v63_v22, %v2032_v45 }
  0x3c   :  { %515 = vmatpush.msra.mxu2 %v398_v25  ;;  %542 = vmatpush.msra.mxu3 %v1823_v8  ;;  %v830_v56 = vand.u32 4294901760, %v2024_v35  ;;  %v2057_v25 = vand.u32 4294901760, %v55_v48  ;;  %v630_v4 = vsub.f32 %v2014_v31, %v629_v57 }
  0x3d   :  { %517 = vmatmul.f32.vlgmr.msra.gmra.mxu2 %v1837_v37  ;;  %559 = vmatpush.msrb.mxu0 %v1926_v11  ;;  %v612_v33 = vsub.f32 %v1968_v49, %v611_v55  ;;  %v607_v47 = vand.u32 4294901760, %v606_v13  ;;  %v836_v5 = vand.u32 4294901760, %v2042_v61  ;;  %v842_v50 = vand.u32 4294901760, %v2055_v16 }
  0x3e   :  { %654 = vmatpush.msrb.mxu2 %v1942_v26  ;;  %466 = vmatpush.msra.mxu1 %v1823_v8  ;;  %v595_v8 = vand.u32 4294901760, %v594_v59  ;;  %v831_v10 = vsub.f32 %v2024_v35, %v830_v56  ;;  %v2082_v53 = vsub.f32 %v55_v48, %v2057_v25  ;;  %v631_v59 = vand.u32 4294901760, %v630_v4 }
  0x3f   :  { %544 = vmatpush.msra.mxu3 %v1846_v44  ;;  %441 = vmatmul.f32.vlgmr.msra.gmra.mxu0 %v1855_v46  ;;  %v613_v23 = vand.u32 4294901760, %v612_v33  ;;  %v837_v1 = vsub.f32 %v2042_v61, %v836_v5  ;;  %v2091_v13 = vand.u32 4294901760, %v47_v20  ;;  %v637_v33 = vand.u32 4294901760, %v636_v36 }
  0x40   :  { %546 = vmatmul.f32.vlgmr.msra.gmra.mxu3 %v1837_v37  ;;  %561 = vmatpush.msrb.mxu0 %v1933_v19  ;;  %v832_v22 = vand.u32 4294901760, %v831_v10  ;;  %v843_v38 = vsub.f32 %v2055_v16, %v842_v50 }
  0x41   :  { %657 = vmatpush.msrb.mxu2 %v1952_v29  ;;  %691 = vmatpush.msrb.mxu3 %v1926_v11  ;;  %v838_v48 = vand.u32 4294901760, %v837_v1 }
  0x42   :  { %468 = vmatpush.msra.mxu1 %v1846_v44  ;;  %563 = vmatpush.msrb.mxu0 %v1937_v21  ;;  %v618_v44 = vsub.f32 %v1986_v60, %v617_v30 }
  0x43   :  { %472 = vmatmul.f32.vlgmr.msra.gmra.mxu1 %v1874_v15  ;;  %660 = vmatpush.msrb.mxu2 %v1957_v34 }
  0x44   :  { %596 = vmatpush.msrb.mxu1 %v595_v8  ;;  %693 = vmatpush.msrb.mxu3 %v1933_v19  ;;  %v619_v3 = vand.u32 4294901760, %v618_v44  ;;  %v2096_v8 = vsub.f32 %v51_v2, %v2074_v17  ;;  %v849_v44 = vsub.f32 %v2067_v9, %v848_v6 }
  0x45   :  { %565 = vmatpush.msrb.mxu0 %v1947_v27  ;;  %663 = vmatpush.msrb.mxu2 %v1968_v49 }
  0x46   :  { %602 = vmatpush.msrb.mxu1 %v601_v39  ;;  %695 = vmatpush.msrb.mxu3 %v1937_v21  ;;  %v854_v39 = vand.u32 4294901760, %v2082_v53  ;;  %v860_v26 = vand.u32 4294901760, %v2096_v8  ;;  %v850_v29 = vand.u32 4294901760, %v849_v44 }
  0x47   :  { %567 = vmatpush.msrb.mxu0 %v1963_v42  ;;  %666 = vmatpush.msrb.mxu2 %v1986_v60 }
  0x48   :  { %608 = vmatpush.msrb.mxu1 %v607_v47  ;;  %697 = vmatpush.msrb.mxu3 %v1947_v27  ;;  %v2103_v47 = vand.u32 4294901760, %v43_v58  ;;  %v855_v24 = vsub.f32 %v2082_v53, %v854_v39 }
  0x49   :  { %569 = vmatpush.msrb.mxu0 %v1974_v52  ;;  %669 = vmatpush.msrb.mxu2 %v2001_v7 }
  0x4a   :  { %614 = vmatpush.msrb.mxu1 %v613_v23  ;;  %699 = vmatpush.msrb.mxu3 %v1963_v42  ;;  %v2113_v23 = vsub.f32 %v47_v20, %v2091_v13  ;;  %v2123_v2 = vsub.f32 %v43_v58, %v2103_v47  ;;  %v856_v34 = vand.u32 4294901760, %v855_v24  ;;  %v1033_v58 = vld [vmem:[%s2503_s2 + $0x30] sm:$0xff] }
  0x4b   :  { %571 = vmatpush.msrb.mxu0 %v1988_v63  ;;  %672 = vmatpush.msrb.mxu2 %v2014_v31  ;;  %v2329_v44 = vand.u32 4294901760, %v1033_v58 }
  0x4c   :  { %620 = vmatpush.msrb.mxu1 %v619_v3  ;;  %701 = vmatpush.msrb.mxu3 %v1974_v52  ;;  %v861_v3 = vsub.f32 %v2096_v8, %v860_v26 }
  0x4d   :  { %573 = vmatpush.msrb.mxu0 %v2003_v12  ;;  %675 = vmatpush.msrb.mxu2 %v2030_v43 }
  0x4e   :  { %626 = vmatpush.msrb.mxu1 %v625_v28  ;;  %703 = vmatpush.msrb.mxu3 %v1988_v63  ;;  %v862_v49 = vand.u32 4294901760, %v861_v3 }
  0x4f   :  { %724 = vmatpush.msra.mxu0 %v593_v41  ;;  %796 = vmatpush.msra.mxu2 %v1993_v0  ;;  %v844_v41 = vand.u32 4294901760, %v843_v38 }
  0x50   :  { %632 = vmatpush.msrb.mxu1 %v631_v59  ;;  %705 = vmatpush.msrb.mxu3 %v2003_v12 }
  0x51   :  { %728 = vmatpush.msra.mxu0 %v599_v51  ;;  %798 = vmatpush.msra.mxu2 %v2016_v32  ;;  %v866_v51 = vand.u32 4294901760, %v2113_v23 }
  0x52   :  { %833 = vmatpush.msra.mxu3 %v832_v22  ;;  %638 = vmatpush.msrb.mxu1 %v637_v33  ;;  %v1032_v22 = vld [vmem:[%s2503_s2 + $0x28] sm:$0xff] }
  0x53   :  { %732 = vmatpush.msra.mxu0 %v605_v54  ;;  %800 = vmatpush.msra.mxu2 %v2032_v45 }
  0x54   :  { %767 = vmatpush.msra.mxu1 %v1926_v11  ;;  %839 = vmatpush.msra.mxu3 %v838_v48  ;;  %v872_v11 = vand.u32 4294901760, %v2123_v2 }
  0x55   :  { %736 = vmatpush.msra.mxu0 %v611_v55  ;;  %802 = vmatpush.msra.mxu2 %v2044_v14 }
  0x56   :  { %769 = vmatpush.msra.mxu1 %v1933_v19  ;;  %845 = vmatpush.msra.mxu3 %v844_v41  ;;  %v867_v19 = vsub.f32 %v2113_v23, %v866_v51  ;;  %v873_v54 = vsub.f32 %v2123_v2, %v872_v11 }
  0x57   :  { %740 = vmatpush.msra.mxu0 %v617_v30  ;;  %804 = vmatpush.msra.mxu2 %v2057_v25 }
  0x58   :  { %771 = vmatpush.msra.mxu1 %v1937_v21  ;;  %851 = vmatpush.msra.mxu3 %v850_v29  ;;  %v868_v21 = vand.u32 4294901760, %v867_v19  ;;  %v2341_v29 = vsub.f32 %v1033_v58, %v2329_v44 }
  0x59   :  { %744 = vmatpush.msra.mxu0 %v623_v40  ;;  %806 = vmatpush.msra.mxu2 %v2074_v17  ;;  %v1036_v40 = vld [vmem:[%s2503_s2 + $0x48] sm:$0xff] }
  0x5a   :  { %773 = vmatpush.msra.mxu1 %v1947_v27  ;;  %857 = vmatpush.msra.mxu3 %v856_v34  ;;  %v874_v27 = vand.u32 4294901760, %v873_v54 }
  0x5b   :  { %678 = vmatmul.f32.vlgmr.msrb.gmra.mxu2 %v1855_v46  ;;  %748 = vmatpush.msra.mxu0 %v629_v57  ;;  %v2260_v57 = vand.u32 4294901760, %v1036_v40 }
  0x5c   :  { %775 = vmatpush.msra.mxu1 %v1963_v42  ;;  %808 = vmatpush.msra.mxu2 %v2091_v13 }
  0x5d   :  { %863 = vmatpush.msra.mxu3 %v862_v49  ;;  %579 = vmatmul.f32.vlgmr.msrb.gmra.mxu0 %v1900_v18 }
  0x5e   :  { %709 = vmatmul.f32.vlgmr.msrb.gmra.mxu3 %v1874_v15  ;;  %752 = vmatpush.msra.mxu0 %v635_v62 }
  0x5f   :  { %777 = vmatpush.msra.mxu1 %v1974_v52  ;;  %810 = vmatpush.msra.mxu2 %v2103_v47 }
  0x60   :  { %869 = vmatpush.msra.mxu3 %v868_v21  ;;  %891 = vmatpush.msrb.mxu0 %v2024_v35  ;;  %v1037_v35 = vld [vmem:[%s2503_s2 + $0x50] sm:$0xff]  ;;  %v1031_v21 = vld [vmem:[%s2503_s2 + $0x20] sm:$0xff] }
  0x61   :  { %961 = vmatpush.msrb.mxu2 %v830_v56  ;;  %640 = vmatmul.f32.vlgmr.msrb.gmra.mxu1 %v1837_v37 }
  0x62   :  { %779 = vmatpush.msra.mxu1 %v1988_v63  ;;  %875 = vmatpush.msra.mxu3 %v874_v27 }
  0x63   :  { %894 = vmatpush.msrb.mxu0 %v2042_v61  ;;  %965 = vmatpush.msrb.mxu2 %v836_v5  ;;  %v1035_v61 = vld [vmem:[%s2503_s2 + $0x40] sm:$0xff]  ;;  %v2282_v5 = vsub.f32 %v1036_v40, %v2260_v57 }
  0x64   :  { %1004 = vmatpush.msrb.mxu3 %v1993_v0  ;;  %781 = vmatpush.msra.mxu1 %v2003_v12  ;;  %v2292_v28 = vand.u32 4294901760, %v1035_v61 }
  0x65   :  { %897 = vmatpush.msrb.mxu0 %v2055_v16  ;;  %969 = vmatpush.msrb.mxu2 %v842_v50 }
  0x66   :  { %928 = vmatpush.msrb.mxu1 %v1993_v0  ;;  %1006 = vmatpush.msrb.mxu3 %v2016_v32  ;;  %v1039_v0 = vld [vmem:[%s2503_s2 + $0x60] sm:$0xff] }
  0x67   :  { %900 = vmatpush.msrb.mxu0 %v2067_v9  ;;  %973 = vmatpush.msrb.mxu2 %v848_v6  ;;  %v2243_v31 = vand.u32 4294901760, %v1039_v0  ;;  %v1034_v9 = vld [vmem:[%s2503_s2 + $0x38] sm:$0xff]  ;;  %v2307_v6 = vsub.f32 %v1035_v61, %v2292_v28 }
  0x68   :  { %930 = vmatpush.msrb.mxu1 %v2016_v32  ;;  %1008 = vmatpush.msrb.mxu3 %v2032_v45  ;;  %v1038_v32 = vld [vmem:[%s2503_s2 + $0x58] sm:$0xff] }
  0x69   :  { %754 = vmatmul.f32.vlgmr.msra.gmra.mxu0 %v1837_v37  ;;  %816 = vmatmul.f32.vlgmr.msra.gmra.mxu2 %v1900_v18  ;;  %v1042_v18 = vld [vmem:[%s2503_s2 + $0x78] sm:$0xff]  ;;  %v2256_v43 = vand.u32 4294901760, %v1038_v32  ;;  %v2271_v16 = vsub.f32 %v1039_v0, %v2243_v31 }
  0x6a   :  { %877 = vmatmul.f32.vlgmr.msra.gmra.mxu3 %v1837_v37  ;;  %903 = vmatpush.msrb.mxu0 %v2082_v53  ;;  %v2209_v42 = vand.u32 4294901760, %v1042_v18  ;;  %v1126_v53 = vand.u32 4294901760, %v2282_v5 }
  0x6b   :  { %932 = vmatpush.msrb.mxu1 %v2032_v45  ;;  %977 = vmatpush.msrb.mxu2 %v854_v39  ;;  %v2258_v45 = vand.u32 4294901760, %v1037_v35  ;;  %v1108_v20 = vand.u32 4294901760, %v2271_v16 }
  0x6c   :  { %1010 = vmatpush.msrb.mxu3 %v2044_v14  ;;  %783 = vmatmul.f32.vlgmr.msra.gmra.mxu1 %v1837_v37  ;;  %v2215_v52 = vsub.f32 %v1042_v18, %v2209_v42  ;;  %v1127_v38 = vsub.f32 %v2282_v5, %v1126_v53 }
  0x6d   :  { %906 = vmatpush.msrb.mxu0 %v2096_v8  ;;  %934 = vmatpush.msrb.mxu1 %v2044_v14  ;;  %v2279_v4 = vsub.f32 %v1037_v35, %v2258_v45  ;;  %v1109_v1 = vsub.f32 %v2271_v16, %v1108_v20  ;;  %v1029_v35 = vld [vmem:[%s2503_s2 + $0x10] sm:$0xff] }
  0x6e   :  { %981 = vmatpush.msrb.mxu2 %v860_v26  ;;  %1012 = vmatpush.msrb.mxu3 %v2057_v25  ;;  %v2332_v26 = vand.u32 4294901760, %v1032_v22  ;;  %v1128_v3 = vand.u32 4294901760, %v1127_v38 }
  0x6f   :  { %909 = vmatpush.msrb.mxu0 %v2113_v23  ;;  %936 = vmatpush.msrb.mxu1 %v2057_v25  ;;  %v2276_v25 = vsub.f32 %v1038_v32, %v2256_v43  ;;  %v1120_v50 = vand.u32 4294901760, %v2279_v4  ;;  %v1110_v39 = vand.u32 4294901760, %v1109_v1  ;;  %v1027_v1 = vld [vmem:[%s2503_s2] sm:$0xff] }
  0x70   :  { %985 = vmatpush.msrb.mxu2 %v866_v51  ;;  %1014 = vmatpush.msrb.mxu3 %v2074_v17  ;;  %v2345_v51 = vsub.f32 %v1032_v22, %v2332_v26  ;;  %v2419_v38 = vand.u32 4294901760, %v1027_v1 }
  0x71   :  { %912 = vmatpush.msrb.mxu0 %v2123_v2  ;;  %938 = vmatpush.msrb.mxu1 %v2074_v17  ;;  %v1114_v36 = vand.u32 4294901760, %v2276_v25  ;;  %v1121_v33 = vsub.f32 %v2279_v4, %v1120_v50 }
  0x72   :  { %989 = vmatpush.msrb.mxu2 %v872_v11  ;;  %1016 = vmatpush.msrb.mxu3 %v2091_v13  ;;  %v1144_v11 = vand.u32 4294901760, %v2341_v29  ;;  %v1150_v19 = vand.u32 4294901760, %v2345_v51 }
  0x73   :  { %915 = vmatmul.f32.vlgmr.msrb.gmra.mxu0 %v1855_v46  ;;  %991 = vmatmul.f32.vlgmr.msrb.gmra.mxu2 %v1837_v37  ;;  %v1041_v46 = vld [vmem:[%s2503_s2 + $0x70] sm:$0xff]  ;;  %v1115_v8 = vsub.f32 %v2276_v25, %v1114_v36  ;;  %v1122_v41 = vand.u32 4294901760, %v1121_v33 }
  0x74   :  { %940 = vmatpush.msrb.mxu1 %v2091_v13  ;;  %1018 = vmatpush.msrb.mxu3 %v2103_v47  ;;  %v2217_v60 = vand.u32 4294901760, %v1041_v46  ;;  %v2309_v13 = vand.u32 4294901760, %v1034_v9  ;;  %v1145_v54 = vsub.f32 %v2341_v29, %v1144_v11  ;;  %v1151_v18 = vsub.f32 %v2345_v51, %v1150_v19 }
  0x75   :  { %1020 = vmatmul.f32.vlgmr.msrb.gmra.mxu3 %v1837_v37  ;;  %1048 = vmatpush.msra.mxu0 %v2209_v42  ;;  %v1040_v37 = vld [vmem:[%s2503_s2 + $0x68] sm:$0xff]  ;;  %v1116_v23 = vand.u32 4294901760, %v1115_v8 }
  0x76   :  { %942 = vmatpush.msrb.mxu1 %v2103_v47  ;;  %1244 = vmatpush.msra.mxu3 %v2209_v42  ;;  %v2226_v63 = vsub.f32 %v1041_v46, %v2217_v60  ;;  %v2228_v55 = vand.u32 4294901760, %v1040_v37  ;;  %v1132_v47 = vand.u32 4294901760, %v2307_v6  ;;  %v2327_v48 = vsub.f32 %v1034_v9, %v2309_v13  ;;  %v1028_v9 = vld [vmem:[%s2503_s2 + $0x8] sm:$0xff] }
  0x77   :  { %946 = vmatmul.f32.vlgmr.msrb.gmra.mxu1 %v1874_v15  ;;  %v1090_v15 = vand.u32 4294901760, %v2215_v52  ;;  %1050 = vmatpush.msra.mxu0 %v2217_v60  ;;  %v2369_v46 = vand.u32 4294901760, %v1031_v21  ;;  %v1146_v0 = vand.u32 4294901760, %v1145_v54  ;;  %v1152_v40 = vand.u32 4294901760, %v1151_v18 }
  0x78   :  { %1191 = vmatpush.msra.mxu2 %v2215_v52  ;;  %1246 = vmatpush.msra.mxu3 %v2217_v60  ;;  %v1096_v12 = vand.u32 4294901760, %v2226_v63  ;;  %v2241_v30 = vsub.f32 %v1040_v37, %v2228_v55  ;;  %v1133_v24 = vsub.f32 %v2307_v6, %v1132_v47  ;;  %v1138_v2 = vand.u32 4294901760, %v2327_v48  ;;  %v1030_v37 = vld [vmem:[%s2503_s2 + $0x18] sm:$0xff] }
  0x79   :  { %v1091_v7 = vsub.f32 %v2215_v52, %v1090_v15  ;;  %1052 = vmatpush.msra.mxu0 %v2228_v55  ;;  %v2380_v32 = vand.u32 4294901760, %v1030_v37 }
  0x7a   :  { %1194 = vmatpush.msra.mxu2 %v2226_v63  ;;  %1248 = vmatpush.msra.mxu3 %v2228_v55  ;;  %v1097_v56 = vsub.f32 %v2226_v63, %v1096_v12  ;;  %v1102_v62 = vand.u32 4294901760, %v2241_v30  ;;  %v1139_v34 = vsub.f32 %v2327_v48, %v1138_v2  ;;  %v1134_v49 = vand.u32 4294901760, %v1133_v24 }
  0x7b   :  { %v1092_v14 = vand.u32 4294901760, %v1091_v7  ;;  %1054 = vmatpush.msra.mxu0 %v2243_v31  ;;  %v2378_v7 = vsub.f32 %v1031_v21, %v2369_v46 }
  0x7c   :  { %1197 = vmatpush.msra.mxu2 %v2241_v30  ;;  %1250 = vmatpush.msra.mxu3 %v2243_v31  ;;  %v1098_v10 = vand.u32 4294901760, %v1097_v56  ;;  %v1103_v17 = vsub.f32 %v2241_v30, %v1102_v62  ;;  %v1140_v27 = vand.u32 4294901760, %v1139_v34  ;;  %v2392_v56 = vand.u32 4294901760, %v1029_v35 }
  0x7d   :  { %1093 = vmatpush.msra.mxu1 %v1092_v14  ;;  %1056 = vmatpush.msra.mxu0 %v2256_v43  ;;  %v1156_v61 = vand.u32 4294901760, %v2378_v7  ;;  %v2390_v14 = vsub.f32 %v1030_v37, %v2380_v32 }
  0x7e   :  { %1200 = vmatpush.msra.mxu2 %v2271_v16  ;;  %1252 = vmatpush.msra.mxu3 %v2256_v43  ;;  %v1104_v59 = vand.u32 4294901760, %v1103_v17  ;;  %v2405_v58 = vsub.f32 %v1029_v35, %v2392_v56 }
  0x7f   :  { %1099 = vmatpush.msra.mxu1 %v1098_v10  ;;  %1058 = vmatpush.msra.mxu0 %v2258_v45  ;;  %v1157_v10 = vsub.f32 %v2378_v7, %v1156_v61  ;;  %v1162_v17 = vand.u32 4294901760, %v2390_v14 }
  0x80   :  { %1203 = vmatpush.msra.mxu2 %v2276_v25  ;;  %1254 = vmatpush.msra.mxu3 %v2258_v45  ;;  %v1168_v33 = vand.u32 4294901760, %v2405_v58 }
  0x81   :  { %1105 = vmatpush.msra.mxu1 %v1104_v59  ;;  %1060 = vmatpush.msra.mxu0 %v2260_v57  ;;  %v2408_v59 = vand.u32 4294901760, %v1028_v9  ;;  %v1158_v22 = vand.u32 4294901760, %v1157_v10  ;;  %v1163_v8 = vsub.f32 %v2390_v14, %v1162_v17 }
  0x82   :  { %1206 = vmatpush.msra.mxu2 %v2279_v4  ;;  %1256 = vmatpush.msra.mxu3 %v2260_v57  ;;  %v1169_v24 = vsub.f32 %v2405_v58, %v1168_v33 }
  0x83   :  { %1111 = vmatpush.msra.mxu1 %v1110_v39  ;;  %1062 = vmatpush.msra.mxu0 %v2292_v28 }
  0x84   :  { %1209 = vmatpush.msra.mxu2 %v2282_v5  ;;  %1258 = vmatpush.msra.mxu3 %v2292_v28 }
  0x85   :  { %1117 = vmatpush.msra.mxu1 %v1116_v23  ;;  %1064 = vmatpush.msra.mxu0 %v2309_v13  ;;  %v1173_v23 = vsub.f32 %v1028_v9, %v2408_v59 }
  0x86   :  { %1212 = vmatpush.msra.mxu2 %v2307_v6  ;;  %1260 = vmatpush.msra.mxu3 %v2309_v13 }
  0x87   :  { %1123 = vmatpush.msra.mxu1 %v1122_v41  ;;  %1066 = vmatpush.msra.mxu0 %v2329_v44  ;;  %v1164_v41 = vand.u32 4294901760, %v1163_v8  ;;  %v1174_v34 = vand.u32 4294901760, %v1173_v23 }
  0x88   :  { %1215 = vmatpush.msra.mxu2 %v2327_v48  ;;  %1262 = vmatpush.msra.mxu3 %v2329_v44 }
  0x89   :  { %1129 = vmatpush.msra.mxu1 %v1128_v3  ;;  %1068 = vmatpush.msra.mxu0 %v2332_v26  ;;  %v1179_v3 = vsub.f32 %v1027_v1, %v2419_v38  ;;  %v1175_v21 = vsub.f32 %v1173_v23, %v1174_v34 }
  0x8a   :  { %1218 = vmatpush.msra.mxu2 %v2341_v29  ;;  %1264 = vmatpush.msra.mxu3 %v2332_v26 }
  0x8b   :  { %1135 = vmatpush.msra.mxu1 %v1134_v49  ;;  %1070 = vmatpush.msra.mxu0 %v2369_v46  ;;  %v1170_v49 = vand.u32 4294901760, %v1169_v24  ;;  %v1180_v54 = vand.u32 4294901760, %v1179_v3  ;;  %v1176_v37 = vand.u32 4294901760, %v1175_v21  ;;  %v1389_v21 = vld [vmem:[%s2505_s4] sm:$0xff] }
  0x8c   :  { %1221 = vmatpush.msra.mxu2 %v2345_v51  ;;  %1266 = vmatpush.msra.mxu3 %v2369_v46 }
  0x8d   :  { %1141 = vmatpush.msra.mxu1 %v1140_v27  ;;  %1072 = vmatpush.msra.mxu0 %v2380_v32  ;;  %v1181_v27 = vsub.f32 %v1179_v3, %v1180_v54 }
  0x8e   :  { %1224 = vmatpush.msra.mxu2 %v2378_v7  ;;  %1268 = vmatpush.msra.mxu3 %v2380_v32 }
  0x8f   :  { %1147 = vmatpush.msra.mxu1 %v1146_v0  ;;  %1074 = vmatpush.msra.mxu0 %v2392_v56  ;;  %v1182_v35 = vand.u32 4294901760, %v1181_v27 }
  0x90   :  { %1227 = vmatpush.msra.mxu2 %v2390_v14  ;;  %1270 = vmatpush.msra.mxu3 %v2392_v56 }
  0x91   :  { %1153 = vmatpush.msra.mxu1 %v1152_v40  ;;  %1076 = vmatpush.msra.mxu0 %v2408_v59 }
  0x92   :  { %1230 = vmatpush.msra.mxu2 %v2405_v58  ;;  %1272 = vmatpush.msra.mxu3 %v2408_v59 }
  0x93   :  { %1159 = vmatpush.msra.mxu1 %v1158_v22  ;;  %1078 = vmatpush.msra.mxu0 %v2419_v38 }
  0x94   :  { %1233 = vmatpush.msra.mxu2 %v1173_v23  ;;  %1274 = vmatpush.msra.mxu3 %v2419_v38  ;;  %v1391_v23 = vld [vmem:[%s2505_s4 + $0x10] sm:$0xff] }
  0x95   :  { %1165 = vmatpush.msra.mxu1 %v1164_v41  ;;  %1285 = vmatpush.msrb.mxu0 %v1090_v15  ;;  %v1415_v24 = vand.u32 4294901760, %v1391_v23 }
  0x96   :  { %1236 = vmatpush.msra.mxu2 %v1179_v3  ;;  %v1390_v3 = vld [vmem:[%s2505_s4 + $0x8] sm:$0xff] }
  0x97   :  { %1171 = vmatpush.msra.mxu1 %v1170_v49  ;;  %1289 = vmatpush.msrb.mxu0 %v1096_v12  ;;  %v1449_v49 = vsub.f32 %v1391_v23, %v1415_v24 }
  0x99   :  { %1293 = vmatpush.msrb.mxu0 %v1102_v62  ;;  %1177 = vmatpush.msra.mxu1 %v1176_v37 }
  0x9b   :  { %1297 = vmatpush.msrb.mxu0 %v1108_v20  ;;  %1183 = vmatpush.msra.mxu1 %v1182_v35 }
  0x9d   :  { %1352 = vmatpush.msrb.mxu1 %v2209_v42  ;;  %1301 = vmatpush.msrb.mxu0 %v1114_v36 }
  0x9f   :  { %1354 = vmatpush.msrb.mxu1 %v2217_v60  ;;  %1305 = vmatpush.msrb.mxu0 %v1120_v50 }
  0xa1   :  { %1356 = vmatpush.msrb.mxu1 %v2228_v55  ;;  %1309 = vmatpush.msrb.mxu0 %v1126_v53 }
  0xa3   :  { %1358 = vmatpush.msrb.mxu1 %v2243_v31  ;;  %1313 = vmatpush.msrb.mxu0 %v1132_v47 }
  0xa5   :  { %1360 = vmatpush.msrb.mxu1 %v2256_v43  ;;  %1317 = vmatpush.msrb.mxu0 %v1138_v2 }
  0xa6   :  { %v2421_v39 = vpop.f32.mrf.mxu0 }
  0xa7   :  { %1362 = vmatpush.msrb.mxu1 %v2258_v45  ;;  %1321 = vmatpush.msrb.mxu0 %v1144_v11 }
  0xa9   :  { %1364 = vmatpush.msrb.mxu1 %v2260_v57  ;;  %1325 = vmatpush.msrb.mxu0 %v1150_v19 }
  0xaa   :  { %v167_v18 = vpop.f32.mrf.mxu1  ;;  %v205_v52 = vpop.f32.mrf.mxu2 }
  0xab   :  { %1366 = vmatpush.msrb.mxu1 %v2292_v28  ;;  %1329 = vmatpush.msrb.mxu0 %v1156_v61  ;;  %v168_v4 = vadd.f32 %v167_v18, %v2421_v39  ;;  %v1450_v18 = vand.u32 4294901760, %v1449_v49 }
  0xac   :  { %v236_v0 = vpop.f32.mrf.mxu3 }
  0xad   :  { %1368 = vmatpush.msrb.mxu1 %v2309_v13  ;;  %1333 = vmatpush.msrb.mxu0 %v1162_v17  ;;  %v206_v50 = vadd.f32 %v205_v52, %v168_v4  ;;  %v1451_v52 = vsub.f32 %v1449_v49, %v1450_v18 }
  0xaf   :  { %1370 = vmatpush.msrb.mxu1 %v2329_v44  ;;  %1337 = vmatpush.msrb.mxu0 %v1168_v33  ;;  %v237_v44 = vadd.f32 %v236_v0, %v206_v50  ;;  %v1419_v0 = vand.u32 4294901760, %v1389_v21 }
  0xb0   :  { %v281_v15 = vpop.f32.mrf.mxu0 }
  0xb1   :  { %1372 = vmatpush.msrb.mxu1 %v2332_v26  ;;  %1341 = vmatpush.msrb.mxu0 %v1174_v34  ;;  %v282_v11 = vadd.f32 %v281_v15, %v237_v44 }
  0xb3   :  { %v310_v63 = vpop.f32.mrf.mxu1  ;;  %1374 = vmatpush.msrb.mxu1 %v2369_v46  ;;  %1345 = vmatpush.msrb.mxu0 %v1180_v54  ;;  %v1417_v54 = vand.u32 4294901760, %v1390_v3 }
  0xb4   :  { %v311_v14 = vadd.f32 %v310_v63, %v282_v11  ;;  %v1461_v63 = vsub.f32 %v1389_v21, %v1419_v0  ;;  %v1622_v11 = vld [vmem:[%s2506_s5] ss:$0 sm:$0xff] }
  0xb5   :  { %1376 = vmatpush.msrb.mxu1 %v2380_v32  ;;  %v1455_v37 = vsub.f32 %v1390_v3, %v1417_v54 }
  0xb6   :  { %v343_v42 = vpop.f32.mrf.mxu2 }
  0xb7   :  { %1378 = vmatpush.msrb.mxu1 %v2392_v56  ;;  %v1456_v15 = vand.u32 4294901760, %v1455_v37 }
  0xb9   :  { %v404_v12 = vpop.f32.mrf.mxu3  ;;  %1380 = vmatpush.msrb.mxu1 %v2408_v59 }
  0xba   :  { %v405_v25 = vadd.f32 %v404_v12, %v343_v42  ;;  %v1452_v12 = vand.u32 4294901760, %v1451_v52  ;;  %v1457_v42 = vsub.f32 %v1455_v37, %v1456_v15 }
  0xbb   :  { %1382 = vmatpush.msrb.mxu1 %v2419_v38  ;;  %v1392_v38 = vld [vmem:[%s2505_s4 + $0x18] sm:$0xff] }
  0xbc   :  { %v442_v60 = vpop.f32.mrf.mxu0  ;;  %v1413_v39 = vand.u32 4294901760, %v1392_v38 }
  0xbd   :  { %v443_v20 = vadd.f32 %v442_v60, %v405_v25  ;;  %v1462_v60 = vand.u32 4294901760, %v1461_v63 }
  0xbe   :  { %v2481_v41 = vsub.f32 %v1392_v38, %v1413_v39  ;;  %1414 = vmatpush.msrb.mxu2 %v1413_v39 }
  0xc0   :  { %v473_v55 = vpop.f32.mrf.mxu1  ;;  %v518_v31 = vpop.f32.mrf.mxu2  ;;  %v1444_v34 = vand.u32 4294901760, %v2481_v41  ;;  %1416 = vmatpush.msrb.mxu2 %v1415_v24 }
  0xc1   :  { %v474_v13 = vadd.f32 %v473_v55, %v443_v20  ;;  %v1458_v55 = vand.u32 4294901760, %v1457_v42 }
  0xc2   :  { %v1445_v27 = vsub.f32 %v2481_v41, %v1444_v34  ;;  %1418 = vmatpush.msrb.mxu2 %v1417_v54 }
  0xc3   :  { %v547_v30 = vpop.f32.mrf.mxu3  ;;  %v519_v2 = vadd.f32 %v518_v31, %v474_v13 }
  0xc4   :  { %v1446_v35 = vand.u32 4294901760, %v1445_v27  ;;  %1420 = vmatpush.msrb.mxu2 %v1419_v0 }
  0xc5   :  { %v548_v32 = vadd.f32 %v547_v30, %v519_v2  ;;  %v1463_v30 = vsub.f32 %v1461_v63, %v1462_v60 }
  0xc6   :  { %1447 = vmatpush.msrb.mxu3 %v1446_v35 }
  0xc7   :  { %v1024_v10 = vmax.f32 %v311_v14, %v548_v32  ;;  %v1464_v31 = vand.u32 4294901760, %v1463_v30 }
  0xc8   :  { %1453 = vmatpush.msrb.mxu3 %v1452_v12 }
  0xca   :  { %1459 = vmatpush.msrb.mxu3 %v1458_v55 }
  0xcc   :  { %1465 = vmatpush.msrb.mxu3 %v1464_v31 }
  0xda   :  { %v580_v43 = vpop.f32.mrf.mxu0 }
  0xde   :  { %v641_v45 = vpop.f32.mrf.mxu1  ;;  %v679_v62 = vpop.f32.mrf.mxu2 }
  0xdf   :  { %v642_v5 = vadd.f32 %v641_v45, %v580_v43  ;;  %v1621_v43 = vld [vmem:[%s2504_s3] ss:$0 sm:$0xff] }
  0xe1   :  { %v710_v57 = vpop.f32.mrf.mxu3  ;;  %v680_v53 = vadd.f32 %v679_v62, %v642_v5 }
  0xe3   :  { %v711_v26 = vadd.f32 %v710_v57, %v680_v53 }
  0xe6   :  { %v755_v16 = vpop.f32.mrf.mxu0 }
  0xe7   :  { %v756_v19 = vadd.f32 %v755_v16, %v711_v26 }
  0xe9   :  { %v784_v28 = vpop.f32.mrf.mxu1 }
  0xea   :  { %v785_v56 = vadd.f32 %v784_v28, %v756_v19 }
  0xec   :  { %v817_v36 = vpop.f32.mrf.mxu2 }
  0xed   :  { %v878_v6 = vpop.f32.mrf.mxu3 }
  0xee   :  { %v879_v47 = vadd.f32 %v878_v6, %v817_v36 }
  0xf0   :  { %v916_v48 = vpop.f32.mrf.mxu0 }
  0xf1   :  { %v917_v29 = vadd.f32 %v916_v48, %v879_v47 }
  0xf4   :  { %v947_v51 = vpop.f32.mrf.mxu1 }
  0xf5   :  { %v948_v46 = vadd.f32 %v947_v51, %v917_v29 }
  0xf6   :  { %v992_v7 = vpop.f32.mrf.mxu2 }
  0xf7   :  { %v993_v40 = vadd.f32 %v992_v7, %v948_v46 }
  0xf8   :  { %v1021_v61 = vpop.f32.mrf.mxu3 }
  0xf9   :  { %v1022_v9 = vadd.f32 %v1021_v61, %v993_v40 }
  0xfb   :  { %v1025_v17 = vmax.f32 %v785_v56, %v1022_v9 }
  0xfd   :  { %v1026_v58 = vmax.f32 %v1024_v10, %v1025_v17 }
  0xff   :  { %v1079_v59 = vand.u32 4294901760, %v1026_v58 }
 0x101   :  { %v1080_v1 = vsub.f32 %v1026_v58, %v1079_v59  ;;  %1185 = vmatmul.f32.vlgmr.msra.gmra.mxu1 %v1079_v59 }
 0x103   :  { %1239 = vmatmul.f32.vlgmr.msra.gmra.mxu2 %v1080_v1  ;;  %v1081_v22 = vand.u32 4294901760, %v1080_v1 }
 0x104   :  { %1485 = vmatpush.msra.mxu2 %v2481_v41 }
 0x105   :  { %1278 = vmatmul.f32.vlgmr.msra.gmra.mxu3 %v1081_v22  ;;  %v1082_v8 = vsub.f32 %v1080_v1, %v1081_v22  ;;  %v1586_v1 = vlaneseq }
 0x106   :  { %1488 = vmatpush.msra.mxu2 %v1449_v49  ;;  %1514 = vmatpush.msra.mxu3 %v1413_v39 }
 0x107   :  { %v1083_v33 = vand.u32 4294901760, %v1082_v8  ;;  %v1587_v8 = vand.u32 127, %v1586_v1 }
 0x108   :  { %1491 = vmatpush.msra.mxu2 %v1455_v37  ;;  %1516 = vmatpush.msra.mxu3 %v1415_v24 }
 0x109   :  { %1084 = vmatmul.f32.vlgmr.msra.gmra.mxu0 %v1083_v33  ;;  %1384 = vmatmul.f32.vlgmr.msrb.gmra.mxu1 %v1079_v59  ;;  %vm1588_vm2 = vcmp.ge.s32.totalorder %v1587_v8, 32  ;;  %vm1589_vm3 = vcmp.lt.s32.totalorder %v1587_v8, 96 }
 0x10a   :  { %1494 = vmatpush.msra.mxu2 %v1461_v63  ;;  %1518 = vmatpush.msra.mxu3 %v1417_v54  ;;  %vm1590_vm5 = vmand %vm1588_vm2, %vm1589_vm3 }
 0x10c   :  { %1520 = vmatpush.msra.mxu3 %v1419_v0 }
 0x111   :  { %1347 = vmatmul.f32.vlgmr.msrb.gmra.mxu0 %v1079_v59 }
 0x17e   :  { %v1186_v45 = vpop.f32.mrf.mxu1 }
 0x186   :  { %v1085_v57 = vpop.f32.mrf.mxu0  ;;  %v1240_v25 = vpop.f32.mrf.mxu2 }
 0x187   :  { %v1086_v62 = vadd.f32 %v1621_v43, %v1085_v57  ;;  %v1385_v50 = vpop.f32.mrf.mxu1 }
 0x188   :  { %v1279_v5 = vpop.f32.mrf.mxu3 }
 0x189   :  { %v1187_v16 = vadd.f32 %v1186_v45, %v1086_v62 }
 0x18b   :  { %v1241_v4 = vadd.f32 %v1240_v25, %v1187_v16 }
 0x18d   :  { %v1280_v20 = vadd.f32 %v1279_v5, %v1241_v4 }
 0x18e   :  { %v1348_v28 = vpop.f32.mrf.mxu0 }
 0x18f   :  { %v1349_v36 = vadd.f32 %v1348_v28, %v1280_v20 }
 0x191   :  { %v1386_v53 = vadd.f32 %v1385_v50, %v1349_v36 }
 0x193   :  { %v1388_v6 = vmax.f32 %v1386_v53, 0.0 }
 0x195   :  { %v1399_v13 = vsel %vm1397_vm1, %v1388_v6, 0 }
 0x196   :  { %v1421_v47 = vand.u32 4294901760, %v1399_v13 }
 0x198   :  { %v1422_v48 = vsub.f32 %v1399_v13, %v1421_v47  ;;  %1467 = vmatmul.f32.vlgmr.msrb.gmra.mxu3 %v1421_v47 }
 0x199   :  { %1574 = vmatpush.msrb.mxu3 %v1413_v39 }
 0x19a   :  { %v1423_v44 = vand.u32 4294901760, %v1422_v48 }
 0x19b   :  { %1576 = vmatpush.msrb.mxu3 %v1415_v24 }
 0x19c   :  { %v1424_v26 = vsub.f32 %v1422_v48, %v1423_v44 }
 0x19d   :  { %1578 = vmatpush.msrb.mxu3 %v1417_v54 }
 0x19e   :  { %v1425_v2 = vand.u32 4294901760, %v1424_v26 }
 0x19f   :  { %1580 = vmatpush.msrb.mxu3 %v1419_v0 }
 0x1a0   :  { %1426 = vmatmul.f32.vlgmr.msrb.gmra.mxu2 %v1425_v2  ;;  %1524 = vmatmul.f32.vlgmr.msra.gmra.mxu3 %v1423_v44 }
 0x1a1   :  { %1543 = vmatpush.msrb.mxu2 %v1444_v34 }
 0x1a3   :  { %1547 = vmatpush.msrb.mxu2 %v1450_v18 }
 0x1a5   :  { %1551 = vmatpush.msrb.mxu2 %v1456_v15 }
 0x1a7   :  { %1555 = vmatpush.msrb.mxu2 %v1462_v60 }
 0x1a8   :  { %1497 = vmatmul.f32.vlgmr.msra.gmra.mxu2 %v1422_v48  ;;  %1582 = vmatmul.f32.vlgmr.msrb.gmra.mxu3 %v1421_v47 }
 0x1b0   :  { %1557 = vmatmul.f32.vlgmr.msrb.gmra.mxu2 %v1421_v47 }
 0x21b   :  { %v1468_v29 = vpop.f32.mrf.mxu3 }
 0x223   :  { %v1427_v51 = vpop.f32.mrf.mxu2  ;;  %v1525_v46 = vpop.f32.mrf.mxu3 }
 0x224   :  { %v1428_v19 = vadd.f32 %v1622_v11, %v1427_v51 }
 0x226   :  { %v1469_v32 = vadd.f32 %v1468_v29, %v1428_v19 }
 0x22b   :  { %v1498_v7 = vpop.f32.mrf.mxu2  ;;  %v1583_v9 = vpop.f32.mrf.mxu3 }
 0x22c   :  { %v1499_v40 = vadd.f32 %v1498_v7, %v1469_v32 }
 0x22e   :  { %v1526_v61 = vadd.f32 %v1525_v46, %v1499_v40 }
 0x233   :  { %v1558_v14 = vpop.f32.mrf.mxu2 }
 0x234   :  { %v1559_v56 = vadd.f32 %v1558_v14, %v1526_v61 }
 0x236   :  { %v1584_v10 = vadd.f32 %v1583_v9, %v1559_v56 }
 0x238   :  { %v1617_v17 = vmul.f32 -1.442695, %v1584_v10 }
 0x23a   :  { %1623 = vpow2.f32 %v1617_v17 }
 0x240   :  { %v1624_v58 = vpop.eup %1623 }
 0x241   :  { %v1594_v59 = vadd.f32 1.0, %v1624_v58 }
 0x243   :  { %1625 = vrcp.f32 %v1594_v59  ;;  %v1606_v39 = vand.u32 2147483648, %v1594_v59  ;;  %v1604_v41 = vand.u32 2147483647, %v1594_v59  ;;  %vm1600_vm6 = vweird.f32 %v1594_v59 }
 0x245   :  { %v1607_v3 = vor.u32 1.1754944e-38, %v1606_v39  ;;  %vm1605_vm8 = vcmp.eq.f32.partialorder %v1604_v41, 8.507059e+37 }
 0x249   :  { %v1626_v22 = vpop.eup %1625 }
 0x24a   :  { %v1596_v33 = vmul.f32 %v1626_v22, %v1594_v59  ;;  %vm1601_vm4 = vweird.f32 %v1626_v22 }
 0x24b   :  { %vm1602_vm7 = vmor %vm1600_vm6, %vm1601_vm4 }
 0x24c   :  { %v1597_v38 = vsub.f32 1.0, %v1596_v33 }
 0x24e   :  { %v1598_v23 = vmul.f32 %v1626_v22, %v1597_v38 }
 0x250   :  { %v1599_v24 = vadd.f32 %v1626_v22, %v1598_v23 }
 0x252   :  { %v1603_v34 = vsel %vm1602_vm7, %v1626_v22, %v1599_v24 }
 0x253   :  { %v1608_v49 = vsel %vm1605_vm8, %v1607_v3, %v1603_v34 }
 0x254   :  { %v1610_v54 = vsel %vm1590_vm5, %v1608_v49, %v1584_v10 }
 0x255   :  { %1611 = vst [vmem:[%s2507_s6] sm:$0xff] %v1610_v54 }
 0x256   :  { %1616 = vsyncpa [#allocation3], 1 }

</bundles_post_ra>
